<compile_context>
chip_gen: v7x
topology: tpu7x:2x2x1
jax: 0.10.0
libtpu: 0.0.40
codegen_flags: <defaults>
</compile_context>

<pallas_src>
import functools

import jax
import jax.numpy as jnp
from jax.experimental import pallas as pl
from jax.experimental.pallas import tpu as pltpu

HIDDEN_SIZE = 32
NUM_LAYERS = 2
INPUT_SIZE = 3
BLOCK_N = 1024  # batch tile (lanes); safe for v7x's smaller VMEM too


def _round_up(v, m):
    return ((v + m - 1) // m) * m


def _make_kernel(num_layers, hidden):
    H = hidden

    def kernel(*refs):
        # refs = (seq_T, [w_ih, bias] * L, fc_w, fc_b, out)
        seq_ref = refs[0]
        out_ref = refs[-1]
        p = refs[1:-1]

        h = seq_ref[...]                                   # (in, TN), f32

        for layer in range(num_layers):
            w_ih = p[2 * layer][...]                       # (4H, in)
            bias = p[2 * layer + 1][...]                   # (4H, 1) = b_ih + b_hh

            # gates: (4H, TN) -- batch fills the MXU lane axis.
            gates = jnp.dot(w_ih, h,
                            preferred_element_type=jnp.float32) + bias

            # h0 == c0 == 0  =>  f-gate and c_prev terms are dead.
            i_g = jax.nn.sigmoid(gates[0 * H:1 * H, :])    # input gate
            g_g = jnp.tanh(gates[2 * H:3 * H, :])          # cell candidate
            o_g = jax.nn.sigmoid(gates[3 * H:4 * H, :])    # output gate

            c = i_g * g_g                                  # (H, TN)
            h = o_g * jnp.tanh(c)                          # next layer input

        fc_w = p[-2][...]                                  # (H, 1)
        fc_b = p[-1][...]                                  # (1, 1)
        # VPU multiply + sublane reduce -> lane-dense (1, TN) output.
        out_ref[...] = jnp.sum(h * fc_w, axis=0, keepdims=True) + fc_b

    return kernel


def init_params(key, hidden=HIDDEN_SIZE, num_layers=NUM_LAYERS,
                input_size=INPUT_SIZE):
    """Deterministic init matching PyTorch default U(-1/sqrt(H), 1/sqrt(H))."""
    params = []
    k = 1.0 / jnp.sqrt(jnp.float32(hidden))
    for layer in range(num_layers):
        in_dim = input_size if layer == 0 else hidden
        key, k1, k2, k3, k4 = jax.random.split(key, 5)
        w_ih = jax.random.uniform(k1, (4 * hidden, in_dim), jnp.float32, -k, k)
        w_hh = jax.random.uniform(k2, (4 * hidden, hidden), jnp.float32, -k, k)
        b_ih = jax.random.uniform(k3, (4 * hidden,), jnp.float32, -k, k)
        b_hh = jax.random.uniform(k4, (4 * hidden,), jnp.float32, -k, k)
        params.append((w_ih, w_hh, b_ih, b_hh))
    key, k5, k6 = jax.random.split(key, 3)
    kf = 1.0 / jnp.sqrt(jnp.float32(hidden))
    fc_w = jax.random.uniform(k5, (1, hidden), jnp.float32, -kf, kf)
    fc_b = jax.random.uniform(k6, (1,), jnp.float32, -kf, kf)
    return params, (fc_w, fc_b)


@functools.partial(jax.jit,
                   static_argnames=("hidden", "num_layers", "block_n"))
def lstm_pinn_forward(x, y, t, lstm_params, fc_params,
                      hidden=HIDDEN_SIZE, num_layers=NUM_LAYERS,
                      block_n=BLOCK_N):
    # Glue: cat + unsqueeze(1) with seq_len==1 collapses to a (3, N) slab
    # (feature-major so the batch lands on the lane axis inside the kernel).
    xf = x.reshape(-1).astype(jnp.float32)
    yf = y.reshape(-1).astype(jnp.float32)
    tf = t.reshape(-1).astype(jnp.float32)
    n = xf.shape[0]
    seq_t = jnp.stack([xf, yf, tf], axis=0)                 # (3, N)

    tn = min(block_n, _round_up(n, 128))                    # lane-aligned tile
    n_pad = _round_up(n, tn)
    if n_pad != n:
        seq_t = jnp.pad(seq_t, ((0, 0), (0, n_pad - n)))

    flat = [seq_t]
    for (w_ih, w_hh, b_ih, b_hh) in lstm_params:
        flat.append(w_ih)                                   # (4H, in)  un-transposed
        flat.append((b_ih + b_hh).reshape(-1, 1))           # (4H, 1)
        # w_hh is dead (zero initial hidden state) -> never sent to the kernel.
    fc_w, fc_b = fc_params
    flat.append(fc_w.reshape(hidden, 1))                    # (H, 1)
    flat.append(fc_b.reshape(1, 1))                         # (1, 1)

    kernel = _make_kernel(num_layers, hidden)

    grid = (n_pad // tn,)
    in_specs = [pl.BlockSpec((seq_t.shape[0], tn), lambda i: (0, i))]
    in_specs += [pl.BlockSpec(a.shape, lambda i: (0, 0)) for a in flat[1:]]
    out_spec = pl.BlockSpec((1, tn), lambda i: (0, i))

    out_t = pl.pallas_call(
        kernel,
        out_shape=jax.ShapeDtypeStruct((1, n_pad), jnp.float32),
        grid=grid,
        in_specs=in_specs,
        out_specs=out_spec,
        compiler_params=pltpu.CompilerParams(
            dimension_semantics=("parallel",)),
    )(*flat)

    return out_t[0, :n].reshape(n, 1)                       # (N, 1)


def _reference(x, y, t, lstm_params, fc_params, hidden=HIDDEN_SIZE):
    """Pure-JAX reference (mirrors torch.nn.LSTM with seq_len=1, zero state)."""
    h = jnp.concatenate([x, y, t], axis=-1).astype(jnp.float32)
    n = h.shape[0]
    H = hidden
    for (w_ih, w_hh, b_ih, b_hh) in lstm_params:
        gates = h @ w_ih.T + jnp.zeros((n, H)) @ w_hh.T + b_ih + b_hh
        i = jax.nn.sigmoid(gates[:, 0 * H:1 * H])
        f = jax.nn.sigmoid(gates[:, 1 * H:2 * H])
        g = jnp.tanh(gates[:, 2 * H:3 * H])
        o = jax.nn.sigmoid(gates[:, 3 * H:4 * H])
        c = f * jnp.zeros((n, H)) + i * g
        h = o * jnp.tanh(c)
    fc_w, fc_b = fc_params
    return h @ fc_w.T + fc_b


if __name__ == "__main__":
    key = jax.random.PRNGKey(0)
    kx, ky, kt, kp = jax.random.split(key, 4)

    N = 16  # small batch of collocation points
    x = jax.random.uniform(kx, (N, 1), jnp.float32, -1.0, 1.0)
    y = jax.random.uniform(ky, (N, 1), jnp.float32, -1.0, 1.0)
    t = jax.random.uniform(kt, (N, 1), jnp.float32, 0.0, 1.0)

    lstm_params, fc_params = init_params(kp)

    out = lstm_pinn_forward(x, y, t, lstm_params, fc_params)
    out = jax.block_until_ready(out)

    ref = _reference(x, y, t, lstm_params, fc_params)
    assert out.shape == (N, 1), out.shape
    assert jnp.allclose(out, ref, atol=1e-5, rtol=1e-5), (out, ref)

    print("KERNEL_OK")
</pallas_src>

<mosaic_0001>
module attributes {stable_mosaic.version = 11 : i64} {
  func.func @kernel(%arg0: i32, %arg1: memref<3x128xf32, #tpu.memory_space<vmem>>, %arg2: memref<128x3xf32, #tpu.memory_space<vmem>>, %arg3: memref<128x1xf32, #tpu.memory_space<vmem>>, %arg4: memref<128x32xf32, #tpu.memory_space<vmem>>, %arg5: memref<128x1xf32, #tpu.memory_space<vmem>>, %arg6: memref<32x1xf32, #tpu.memory_space<vmem>>, %arg7: memref<1x1xf32, #tpu.memory_space<vmem>>, %arg8: memref<1x128xf32, #tpu.memory_space<vmem>>) attributes {dimension_semantics = [#tpu.dimension_semantics<parallel>], iteration_bounds = array<i64: 1>, scalar_prefetch = 0 : i64, scratch_operands = 0 : i64, tpu.core_type = #tpu.core_type<tc>, window_params = [{transform_indices = @transform_0, window_bounds = array<i64: 3, 128>}, {pipeline_mode = #tpu.pipeline_mode<synchronous>, transform_indices = @transform_1, window_bounds = array<i64: 128, 3>}, {pipeline_mode = #tpu.pipeline_mode<synchronous>, transform_indices = @transform_2, window_bounds = array<i64: 128, 1>}, {pipeline_mode = #tpu.pipeline_mode<synchronous>, transform_indices = @transform_3, window_bounds = array<i64: 128, 32>}, {pipeline_mode = #tpu.pipeline_mode<synchronous>, transform_indices = @transform_4, window_bounds = array<i64: 128, 1>}, {pipeline_mode = #tpu.pipeline_mode<synchronous>, transform_indices = @transform_5, window_bounds = array<i64: 32, 1>}, {pipeline_mode = #tpu.pipeline_mode<synchronous>, transform_indices = @transform_6, window_bounds = array<i64: 1, 1>}, {transform_indices = @transform_7, window_bounds = array<i64: 1, 128>}]} {
    %c0 = arith.constant 0 : index
    %c0_0 = arith.constant 0 : index
    %0 = vector.load %arg1[%c0, %c0_0] : memref<3x128xf32, #tpu.memory_space<vmem>>, vector<3x128xf32>
    %c0_1 = arith.constant 0 : index
    %c0_2 = arith.constant 0 : index
    %1 = vector.load %arg2[%c0_1, %c0_2] : memref<128x3xf32, #tpu.memory_space<vmem>>, vector<128x3xf32>
    %c0_3 = arith.constant 0 : index
    %c0_4 = arith.constant 0 : index
    %2 = vector.load %arg3[%c0_3, %c0_4] : memref<128x1xf32, #tpu.memory_space<vmem>>, vector<128x1xf32>
    %cst = arith.constant dense<0.000000e+00> : vector<128x128xf32>
    %3 = tpu.matmul %1, %0, %cst {dimension_numbers = #tpu.dot_dimension_numbers<[1], [0], [0], [1], [0, 0, 1, 1], [], []>} : vector<128x3xf32>, vector<3x128xf32>, vector<128x128xf32> -> vector<128x128xf32>
    %4 = vector.broadcast %2 : vector<128x1xf32> to vector<128x128xf32>
    %5 = arith.addf %3, %4 : vector<128x128xf32>
    %6 = vector.extract_strided_slice %5 {offsets = [0, 0], sizes = [32, 128], strides = [1, 1]} : vector<128x128xf32> to vector<32x128xf32>
    %7 = arith.negf %6 : vector<32x128xf32>
    %8 = math.exp %7 : vector<32x128xf32>
    %cst_5 = arith.constant 1.000000e+00 : f32
    %9 = vector.broadcast %cst_5 : f32 to vector<32x128xf32>
    %10 = arith.addf %9, %8 : vector<32x128xf32>
    %11 = arith.divf %9, %10 : vector<32x128xf32>
    %12 = vector.extract_strided_slice %5 {offsets = [64, 0], sizes = [32, 128], strides = [1, 1]} : vector<128x128xf32> to vector<32x128xf32>
    %13 = math.tanh %12 : vector<32x128xf32>
    %14 = vector.extract_strided_slice %5 {offsets = [96, 0], sizes = [32, 128], strides = [1, 1]} : vector<128x128xf32> to vector<32x128xf32>
    %15 = arith.negf %14 : vector<32x128xf32>
    %16 = math.exp %15 : vector<32x128xf32>
    %cst_6 = arith.constant 1.000000e+00 : f32
    %17 = vector.broadcast %cst_6 : f32 to vector<32x128xf32>
    %18 = arith.addf %17, %16 : vector<32x128xf32>
    %19 = arith.divf %17, %18 : vector<32x128xf32>
    %20 = arith.mulf %11, %13 : vector<32x128xf32>
    %21 = math.tanh %20 : vector<32x128xf32>
    %22 = arith.mulf %19, %21 : vector<32x128xf32>
    %c0_7 = arith.constant 0 : index
    %c0_8 = arith.constant 0 : index
    %23 = vector.load %arg4[%c0_7, %c0_8] : memref<128x32xf32, #tpu.memory_space<vmem>>, vector<128x32xf32>
    %c0_9 = arith.constant 0 : index
    %c0_10 = arith.constant 0 : index
    %24 = vector.load %arg5[%c0_9, %c0_10] : memref<128x1xf32, #tpu.memory_space<vmem>>, vector<128x1xf32>
    %cst_11 = arith.constant dense<0.000000e+00> : vector<128x128xf32>
    %25 = tpu.matmul %23, %22, %cst_11 {dimension_numbers = #tpu.dot_dimension_numbers<[1], [0], [0], [1], [0, 0, 1, 1], [], []>} : vector<128x32xf32>, vector<32x128xf32>, vector<128x128xf32> -> vector<128x128xf32>
    %26 = vector.broadcast %24 : vector<128x1xf32> to vector<128x128xf32>
    %27 = arith.addf %25, %26 : vector<128x128xf32>
    %28 = vector.extract_strided_slice %27 {offsets = [0, 0], sizes = [32, 128], strides = [1, 1]} : vector<128x128xf32> to vector<32x128xf32>
    %29 = arith.negf %28 : vector<32x128xf32>
    %30 = math.exp %29 : vector<32x128xf32>
    %cst_12 = arith.constant 1.000000e+00 : f32
    %31 = vector.broadcast %cst_12 : f32 to vector<32x128xf32>
    %32 = arith.addf %31, %30 : vector<32x128xf32>
    %33 = arith.divf %31, %32 : vector<32x128xf32>
    %34 = vector.extract_strided_slice %27 {offsets = [64, 0], sizes = [32, 128], strides = [1, 1]} : vector<128x128xf32> to vector<32x128xf32>
    %35 = math.tanh %34 : vector<32x128xf32>
    %36 = vector.extract_strided_slice %27 {offsets = [96, 0], sizes = [32, 128], strides = [1, 1]} : vector<128x128xf32> to vector<32x128xf32>
    %37 = arith.negf %36 : vector<32x128xf32>
    %38 = math.exp %37 : vector<32x128xf32>
    %cst_13 = arith.constant 1.000000e+00 : f32
    %39 = vector.broadcast %cst_13 : f32 to vector<32x128xf32>
    %40 = arith.addf %39, %38 : vector<32x128xf32>
    %41 = arith.divf %39, %40 : vector<32x128xf32>
    %42 = arith.mulf %33, %35 : vector<32x128xf32>
    %43 = math.tanh %42 : vector<32x128xf32>
    %44 = arith.mulf %41, %43 : vector<32x128xf32>
    %c0_14 = arith.constant 0 : index
    %c0_15 = arith.constant 0 : index
    %45 = vector.load %arg6[%c0_14, %c0_15] : memref<32x1xf32, #tpu.memory_space<vmem>>, vector<32x1xf32>
    %c0_16 = arith.constant 0 : index
    %c0_17 = arith.constant 0 : index
    %46 = vector.load %arg7[%c0_16, %c0_17] : memref<1x1xf32, #tpu.memory_space<vmem>>, vector<1x1xf32>
    %47 = vector.broadcast %45 : vector<32x1xf32> to vector<32x128xf32>
    %48 = arith.mulf %44, %47 : vector<32x128xf32>
    %cst_18 = arith.constant dense<0.000000e+00> : vector<128xf32>
    %49 = vector.multi_reduction <add>, %48, %cst_18 [0] : vector<32x128xf32> to vector<128xf32>
    %50 = vector.shape_cast %49 : vector<128xf32> to vector<1x128xf32>
    %51 = vector.broadcast %46 : vector<1x1xf32> to vector<1x128xf32>
    %52 = arith.addf %50, %51 : vector<1x128xf32>
    %c0_19 = arith.constant 0 : index
    %c0_20 = arith.constant 0 : index
    %53 = vector.load %arg8[%c0_19, %c0_20] : memref<1x128xf32, #tpu.memory_space<vmem>>, vector<1x128xf32>
    tpu.vector_store %arg8[%c0_19, %c0_20], %52 {strides = array<i32>} : memref<1x128xf32, #tpu.memory_space<vmem>>, vector<1x128xf32>,
    return
  }
  func.func @transform_0(%arg0: i32) -> (i32, i32) {
    %c0_i32 = arith.constant 0 : i32
    %c0_i32_0 = arith.constant 0 : i32
    return %c0_i32, %arg0 : i32, i32
  }
  func.func @transform_1(%arg0: i32) -> (i32, i32) {
    %c0_i32 = arith.constant 0 : i32
    %c0_i32_0 = arith.constant 0 : i32
    %c0_i32_1 = arith.constant 0 : i32
    return %c0_i32, %c0_i32_0 : i32, i32
  }
  func.func @transform_2(%arg0: i32) -> (i32, i32) {
    %c0_i32 = arith.constant 0 : i32
    %c0_i32_0 = arith.constant 0 : i32
    %c0_i32_1 = arith.constant 0 : i32
    return %c0_i32, %c0_i32_0 : i32, i32
  }
  func.func @transform_3(%arg0: i32) -> (i32, i32) {
    %c0_i32 = arith.constant 0 : i32
    %c0_i32_0 = arith.constant 0 : i32
    %c0_i32_1 = arith.constant 0 : i32
    return %c0_i32, %c0_i32_0 : i32, i32
  }
  func.func @transform_4(%arg0: i32) -> (i32, i32) {
    %c0_i32 = arith.constant 0 : i32
    %c0_i32_0 = arith.constant 0 : i32
    %c0_i32_1 = arith.constant 0 : i32
    return %c0_i32, %c0_i32_0 : i32, i32
  }
  func.func @transform_5(%arg0: i32) -> (i32, i32) {
    %c0_i32 = arith.constant 0 : i32
    %c0_i32_0 = arith.constant 0 : i32
    %c0_i32_1 = arith.constant 0 : i32
    return %c0_i32, %c0_i32_0 : i32, i32
  }
  func.func @transform_6(%arg0: i32) -> (i32, i32) {
    %c0_i32 = arith.constant 0 : i32
    %c0_i32_0 = arith.constant 0 : i32
    %c0_i32_1 = arith.constant 0 : i32
    return %c0_i32, %c0_i32_0 : i32, i32
  }
  func.func @transform_7(%arg0: i32) -> (i32, i32) {
    %c0_i32 = arith.constant 0 : i32
    %c0_i32_0 = arith.constant 0 : i32
    return %c0_i32, %arg0 : i32, i32
  }
}

</mosaic_0001>

<bundles_post_ra>
// kernel: lstm_pinn_forward.1
= control target key start
LH: loop header
LB: loop body
LE: loop exit
PB: predicated region body
PF: predicated region fallthrough
CT: control target
= control target key end

     0   :  { %vm186_vm0 = vcmask 1042432   ;;  %vm137_vm1 = vcmask 23552   ;;  %v1061_v3 = vmov 0   ;;  %vm503_vm2 = vcmask 261120   ;;  %s1323_s0 = inlined_call_operand.vmem [shape: f32[3,128], index: 0, kind: input, shape index: {}]   ;;  %s1324_s1 = inlined_call_operand.vmem [shape: f32[128,3], index: 1, kind: input, shape index: {}]   ;;  %s1325_s6 = inlined_call_operand.<no memory space> [shape: f32[1,1], index: 6, kind: input, shape index: {}]   ;;  %s1326_s2 = inlined_call_operand.vmem [shape: f32[128,1], index: 2, kind: input, shape index: {}]   ;;  %s1327_s4 = inlined_call_operand.vmem [shape: f32[128,1], index: 4, kind: input, shape index: {}]   ;;  %s1328_s5 = inlined_call_operand.vmem [shape: f32[32,1], index: 5, kind: input, shape index: {}]   ;;  %s1329_s3 = inlined_call_operand.vmem [shape: f32[128,32], index: 3, kind: input, shape index: {}]   ;;  %s1330_s7 = inlined_call_operand.vmem [shape: f32[1,128], index: 7, kind: output, shape index: {}]  }
   0x1   :  { %v28_v0 = vld [vmem:[%s1323_s0] sm:$0x7]  ;;  %v30_v2 = vld [vmem:[%s1324_s1 + $0x8] sm:$0xff]  ;;  %963 = vset.pattern.permute.xlu0 %v1061_v3  ;;  %964 = vset.pattern.permute.xlu1 %v1061_v3  ;;  %v12_v4 = vstv %s1325_s6  ;;  %v31_v5 = vld [vmem:[%s1324_s1 + $0x10] sm:$0xff] }
   0x2   :  { %v29_v1 = vld [vmem:[%s1324_s1] sm:$0xff]  ;;  %896 = vmatprep.subr.msk.mxu0 %vm186_vm0, %v28_v0  ;;  %13 = vst [vmem:[#allocation2] sm:$0x1] %v12_v4  ;;  %v32_v6 = vld [vmem:[%s1324_s1 + $0x18] sm:$0xff]  ;;  %v47_v9 = vld [vmem:[%s1326_s2 + $0x10] sm:$0xff] }
   0x3   :  { %898 = vmatprep.mubr.msk.f32.mxu0 %vm137_vm1, %v29_v1  ;;  %897 = vmatpush3.msk.msra.mxu0 %vm186_vm0, %v28_v0  ;;  %v33_v7 = vld [vmem:[%s1324_s1 + $0x20] sm:$0xff]  ;;  %v46_v10 = vld [vmem:[%s1326_s2 + $0x8] sm:$0xff]  ;;  %v48_v12 = vld [vmem:[%s1326_s2 + $0x18] sm:$0xff] }
   0x4   :  { %899 = vmatmul.mubr.msk.f32.vlgmr.msra.gmra.mrb[0].mxu0 %vm137_vm1, %v30_v2  ;;  %v45_v8 = vld [vmem:[%s1326_s2] sm:$0xff]  ;;  %73 = vperm.xlu1 %964, %v47_v9   ;;  %v34_v11 = vld [vmem:[%s1324_s1 + $0x28] sm:$0xff]  ;;  %v35_v13 = vld [vmem:[%s1324_s1 + $0x30] sm:$0xff] }
   0x5   :  { %901 = vmatprep.mubr.msk.f32.mxu0 %vm137_vm1, %v31_v5  ;;  %63 = vperm.xlu0 %963, %v45_v8   ;;  %v57_v14 = vld [vmem:[%s1326_s2 + $0x60] sm:$0xff]  ;;  %v36_v15 = vld [vmem:[%s1324_s1 + $0x38] sm:$0xff]  ;;  %v58_v16 = vld [vmem:[%s1326_s2 + $0x68] sm:$0xff] }
   0x6   :  { %v37_v17 = vld [vmem:[%s1324_s1 + $0x40] sm:$0xff]  ;;  %v38_v19 = vld [vmem:[%s1324_s1 + $0x48] sm:$0xff]  ;;  %v39_v21 = vld [vmem:[%s1324_s1 + $0x50] sm:$0xff] }
   0x7   :  { %v53_v18 = vld [vmem:[%s1326_s2 + $0x40] sm:$0xff]  ;;  %v54_v20 = vld [vmem:[%s1326_s2 + $0x48] sm:$0xff]  ;;  %v59_v22 = vld [vmem:[%s1326_s2 + $0x70] sm:$0xff] }
   0x8   :  { %902 = vmatmul.mubr.msk.f32.gmra.mrb[2].mxu0 %vm137_vm1, %v32_v6  ;;  %78 = vperm.xlu1 %964, %v48_v12   ;;  %v40_v23 = vld [vmem:[%s1324_s1 + $0x58] sm:$0xff]  ;;  %v41_v25 = vld [vmem:[%s1324_s1 + $0x60] sm:$0xff]  ;;  %v55_v26 = vld [vmem:[%s1326_s2 + $0x50] sm:$0xff] }
   0x9   :  { %904 = vmatprep.mubr.msk.f32.mxu0 %vm137_vm1, %v33_v7  ;;  %68 = vperm.xlu0 %963, %v46_v10   ;;  %v60_v24 = vld [vmem:[%s1326_s2 + $0x78] sm:$0xff]  ;;  %v42_v27 = vld [vmem:[%s1324_s1 + $0x68] sm:$0xff]  ;;  %v43_v29 = vld [vmem:[%s1324_s1 + $0x70] sm:$0xff] }
   0xa   :  { %v56_v28 = vld [vmem:[%s1326_s2 + $0x58] sm:$0xff]  ;;  %v411_v30 = vld [vmem:[%s1327_s4] sm:$0xff]  ;;  %v412_v32 = vld [vmem:[%s1327_s4 + $0x8] sm:$0xff] }
   0xb   :  { %v44_v31 = vld [vmem:[%s1324_s1 + $0x78] sm:$0xff]  ;;  %v413_v33 = vld [vmem:[%s1327_s4 + $0x10] sm:$0xff]  ;;  %v423_v35 = vld [vmem:[%s1327_s4 + $0x60] sm:$0xff] }
   0xc   :  { %905 = vmatmul.mubr.msk.f32.gmra.mrb[4].mxu0 %vm137_vm1, %v34_v11  ;;  %124 = vperm.xlu1 %964, %v58_v16   ;;  %v414_v34 = vld [vmem:[%s1327_s4 + $0x18] sm:$0xff]  ;;  %v424_v36 = vld [vmem:[%s1327_s4 + $0x68] sm:$0xff]  ;;  %v419_v37 = vld [vmem:[%s1327_s4 + $0x40] sm:$0xff] }
   0xd   :  { %907 = vmatprep.mubr.msk.f32.mxu0 %vm137_vm1, %v35_v13  ;;  %119 = vperm.xlu0 %963, %v57_v14   ;;  %v420_v38 = vld [vmem:[%s1327_s4 + $0x48] sm:$0xff]  ;;  %v425_v39 = vld [vmem:[%s1327_s4 + $0x70] sm:$0xff]  ;;  %v426_v41 = vld [vmem:[%s1327_s4 + $0x78] sm:$0xff] }
   0xe   :  { %v421_v40 = vld [vmem:[%s1327_s4 + $0x50] sm:$0xff]  ;;  %v422_v42 = vld [vmem:[%s1327_s4 + $0x58] sm:$0xff]  ;;  %v757_v43 = vld [vmem:[%s1328_s5] sm:$0xff] }
   0xf   :  { %v758_v44 = vld [vmem:[%s1328_s5 + $0x8] sm:$0xff]  ;;  %v759_v45 = vld [vmem:[%s1328_s5 + $0x10] sm:$0xff]  ;;  %v760_v46 = vld [vmem:[%s1328_s5 + $0x18] sm:$0xff] }
  0x10   :  { %908 = vmatmul.mubr.msk.f32.gmra.mrb[6].mxu0 %vm137_vm1, %v36_v15  ;;  %104 = vperm.xlu1 %964, %v54_v20   ;;  %v761_v47 = vld [vmem:[#allocation2] sm:$0x1] }
  0x11   :  { %910 = vmatprep.mubr.msk.f32.mxu0 %vm137_vm1, %v37_v17  ;;  %99 = vperm.xlu0 %963, %v53_v18   ;;  %v395_v48 = vld [vmem:[%s1329_s3] sm:$0xff] }
  0x12   :  { %930 = vmatprep.mubr.msk.f32.mxu1 %vm503_vm2, %v395_v48 }
  0x14   :  { %911 = vmatmul.mubr.msk.f32.gmra.mrb[8].mxu0 %vm137_vm1, %v38_v19  ;;  %134 = vperm.xlu1 %964, %v60_v24  }
  0x15   :  { %913 = vmatprep.mubr.msk.f32.mxu0 %vm137_vm1, %v39_v21  ;;  %129 = vperm.xlu0 %963, %v59_v22  }
  0x18   :  { %914 = vmatmul.mubr.msk.f32.gmra.mrb[10].mxu0 %vm137_vm1, %v40_v23  ;;  %114 = vperm.xlu1 %964, %v56_v28  }
  0x19   :  { %916 = vmatprep.mubr.msk.f32.mxu0 %vm137_vm1, %v41_v25  ;;  %109 = vperm.xlu0 %963, %v55_v26  }
  0x1c   :  { %917 = vmatmul.mubr.msk.f32.gmra.mrb[12].mxu0 %vm137_vm1, %v42_v27  ;;  %434 = vperm.xlu1 %964, %v412_v32  }
  0x1d   :  { %919 = vmatprep.mubr.msk.f32.mxu0 %vm137_vm1, %v43_v29  ;;  %429 = vperm.xlu0 %963, %v411_v30  }
  0x20   :  { %920 = vmatmul.mubr.msk.f32.gmra.mrb[14].mxu0 %vm137_vm1, %v44_v31  ;;  %444 = vperm.xlu1 %964, %v414_v34  }
  0x21   :  { %439 = vperm.xlu0 %963, %v413_v33  }
  0x24   :  { %490 = vperm.xlu1 %964, %v424_v36  }
  0x25   :  { %485 = vperm.xlu0 %963, %v423_v35  }
  0x28   :  { %470 = vperm.xlu1 %964, %v420_v38  }
  0x29   :  { %465 = vperm.xlu0 %963, %v419_v37  }
  0x2c   :  { %475 = vperm.xlu1 %964, %v421_v40  }
  0x2d   :  { %495 = vperm.xlu0 %963, %v425_v39  }
  0x30   :  { %480 = vperm.xlu1 %964, %v422_v42  }
  0x31   :  { %500 = vperm.xlu0 %963, %v426_v41  }
  0x34   :  { %769 = vperm.xlu1 %964, %v758_v44  }
  0x35   :  { %764 = vperm.xlu0 %963, %v757_v43  }
  0x38   :  { %779 = vperm.xlu1 %964, %v760_v46  }
  0x39   :  { %774 = vperm.xlu0 %963, %v759_v45  }
  0x3d   :  { %797 = vperm.xlu0 %963, %v761_v47  }
  0x83   :  { %v74_v49 = vpop.permute.xlu1 %73 }
  0x84   :  { %v64_v50 = vpop.permute.xlu0 %63 }
  0x87   :  { %v79_v51 = vpop.permute.xlu1 %78 }
  0x88   :  { %v69_v52 = vpop.permute.xlu0 %68 }
  0x8b   :  { %v125_v56 = vpop.permute.xlu1 %124 }
  0x8c   :  { %v120_v58 = vpop.permute.xlu0 %119 }
  0x8f   :  { %v105_v2 = vpop.permute.xlu1 %104 }
  0x90   :  { %v100_v5 = vpop.permute.xlu0 %99 }
  0x93   :  { %v135_v9 = vpop.permute.xlu1 %134 }
  0x94   :  { %v130_v11 = vpop.permute.xlu0 %129 }
  0x97   :  { %v115_v21 = vpop.permute.xlu1 %114 }
  0x98   :  { %v110_v24 = vpop.permute.xlu0 %109 }
  0xd7   :  { %v900_v53 = vpop.f32.mrb[0].mxu0 }
  0xd8   :  { %v262_v54 = vadd.f32 %v900_v53, %v69_v52  ;;  %v256_v55 = vpop.f32.mrb[1].mxu0 }
  0xd9   :  { %v257_v57 = vadd.f32 %v256_v55, %v64_v50 }
  0xda   :  { %v828_v59 = vmul.f32 -1.442695, %v262_v54 }
  0xdb   :  { %v827_v60 = vmul.f32 -1.442695, %v257_v57  ;;  %v903_v61 = vpop.f32.mrb[2].mxu0 }
  0xdc   :  { %965 = vpow2.f32 %v828_v59  ;;  %v272_v62 = vadd.f32 %v903_v61, %v79_v51  ;;  %v266_v63 = vpop.f32.mrb[3].mxu0 }
  0xdd   :  { %967 = vpow2.f32 %v827_v60  ;;  %v267_v0 = vadd.f32 %v266_v63, %v74_v49 }
  0xde   :  { %v830_v1 = vmul.f32 -1.442695, %v272_v62 }
  0xdf   :  { %v829_v3 = vmul.f32 -1.442695, %v267_v0  ;;  %v906_v4 = vpop.f32.mrb[4].mxu0 }
  0xe0   :  { %969 = vpow2.f32 %v830_v1  ;;  %v276_v6 = vpop.f32.mrb[5].mxu0 }
  0xe1   :  { %971 = vpow2.f32 %v829_v3 }
  0xe3   :  { %v909_v7 = vpop.f32.mrb[6].mxu0 }
  0xe4   :  { %v284_v8 = vpop.f32.mrb[7].mxu0 }
  0xe6   :  { %v966_v10 = vpop.eup %965 }
  0xe7   :  { %v968_v12 = vpop.eup %967  ;;  %v344_v13 = vadd.f32 1.0, %v966_v10  ;;  %v912_v14 = vpop.f32.mrb[8].mxu0 }
  0xe8   :  { %v343_v15 = vadd.f32 1.0, %v968_v12  ;;  %v298_v16 = vadd.f32 %v912_v14, %v105_v2  ;;  %v292_v17 = vpop.f32.mrb[9].mxu0  ;;  %v397_v12 = vld [vmem:[%s1329_s3 + $0x10] sm:$0xff]  ;;  %v399_v14 = vld [vmem:[%s1329_s3 + $0x20] sm:$0xff] }
  0xe9   :  { %973 = vrcp.f32 %v344_v13  ;;  %v293_v18 = vadd.f32 %v292_v17, %v100_v5  ;;  %v398_v13 = vld [vmem:[%s1329_s3 + $0x18] sm:$0xff] }
  0xea   :  { %v970_v19 = vpop.eup %969  ;;  %975 = vrcp.f32 %v343_v15  ;;  %v400_v15 = vld [vmem:[%s1329_s3 + $0x28] sm:$0xff]  ;;  %v402_v17 = vld [vmem:[%s1329_s3 + $0x38] sm:$0xff] }
  0xeb   :  { %v972_v20 = vpop.eup %971  ;;  %v346_v22 = vadd.f32 1.0, %v970_v19  ;;  %977 = vtanh.f32 %v298_v16  ;;  %v915_v23 = vpop.f32.mrb[10].mxu0  ;;  %v401_v16 = vld [vmem:[%s1329_s3 + $0x30] sm:$0xff]  ;;  %v404_v19 = vld [vmem:[%s1329_s3 + $0x48] sm:$0xff] }
  0xec   :  { %v345_v25 = vadd.f32 1.0, %v972_v20  ;;  %979 = vtanh.f32 %v293_v18  ;;  %v308_v26 = vadd.f32 %v915_v23, %v115_v21  ;;  %v302_v27 = vpop.f32.mrb[11].mxu0  ;;  %v403_v18 = vld [vmem:[%s1329_s3 + $0x40] sm:$0xff]  ;;  %v405_v20 = vld [vmem:[%s1329_s3 + $0x50] sm:$0xff]  ;;  %v406_v21 = vld [vmem:[%s1329_s3 + $0x58] sm:$0xff] }
  0xed   :  { %981 = vrcp.f32 %v346_v22  ;;  %v303_v28 = vadd.f32 %v302_v27, %v110_v24  ;;  %v407_v22 = vld [vmem:[%s1329_s3 + $0x60] sm:$0xff]  ;;  %v408_v23 = vld [vmem:[%s1329_s3 + $0x68] sm:$0xff]  ;;  %v409_v24 = vld [vmem:[%s1329_s3 + $0x70] sm:$0xff] }
  0xee   :  { %983 = vrcp.f32 %v345_v25  ;;  %v410_v25 = vld [vmem:[%s1329_s3 + $0x78] sm:$0xff] }
  0xef   :  { %985 = vtanh.f32 %v308_v26  ;;  %v918_v29 = vpop.f32.mrb[12].mxu0  ;;  %v435_v26 = vpop.permute.xlu1 %434 }
  0xf0   :  { %987 = vtanh.f32 %v303_v28  ;;  %v318_v30 = vadd.f32 %v918_v29, %v125_v56  ;;  %v312_v31 = vpop.f32.mrb[13].mxu0  ;;  %v430_v28 = vpop.permute.xlu0 %429 }
  0xf1   :  { %v313_v32 = vadd.f32 %v312_v31, %v120_v58 }
  0xf2   :  { %v832_v33 = vmul.f32 -1.442695, %v318_v30 }
  0xf3   :  { %v974_v34 = vpop.eup %973  ;;  %v831_v35 = vmul.f32 -1.442695, %v313_v32  ;;  %v921_v36 = vpop.f32.mrb[14].mxu0 }
  0xf4   :  { %v976_v37 = vpop.eup %975  ;;  %989 = vpow2.f32 %v832_v33  ;;  %v328_v38 = vadd.f32 %v921_v36, %v135_v9  ;;  %v322_v39 = vpop.f32.mrb[15].mxu0 }
  0xf5   :  { %v978_v40 = vpop.eup %977  ;;  %991 = vpow2.f32 %v831_v35  ;;  %v323_v41 = vadd.f32 %v322_v39, %v130_v11  ;;  %v396_v11 = vld [vmem:[%s1329_s3 + $0x8] sm:$0xff]  ;;  %v445_v27 = vpop.permute.xlu1 %444 }
  0xf6   :  { %v980_v42 = vpop.eup %979  ;;  %v384_v43 = vmul.f32 %v978_v40, %v974_v34  ;;  %v834_v44 = vmul.f32 -1.442695, %v328_v38  ;;  %v440_v35 = vpop.permute.xlu0 %439 }
  0xf7   :  { %v982_v45 = vpop.eup %981  ;;  %v383_v46 = vmul.f32 %v980_v42, %v976_v37  ;;  %v833_v47 = vmul.f32 -1.442695, %v323_v41 }
  0xf8   :  { %v984_v48 = vpop.eup %983  ;;  %993 = vpow2.f32 %v834_v44 }
  0xf9   :  { %v986_v49 = vpop.eup %985  ;;  %995 = vpow2.f32 %v833_v47  ;;  %v491_v32 = vpop.permute.xlu1 %490 }
  0xfa   :  { %v988_v50 = vpop.eup %987  ;;  %v386_v51 = vmul.f32 %v986_v49, %v982_v45  ;;  %997 = vtanh.f32 %v384_v43 }
  0xfb   :  { %v385_v52 = vmul.f32 %v988_v50, %v984_v48  ;;  %999 = vtanh.f32 %v383_v46  ;;  %v486_v46 = vpop.permute.xlu0 %485 }
  0xfd   :  { %v471_v42 = vpop.permute.xlu1 %470 }
  0xfe   :  { %v990_v53 = vpop.eup %989 }
  0xff   :  { %v992_v54 = vpop.eup %991  ;;  %v372_v55 = vadd.f32 1.0, %v990_v53 }
 0x100   :  { %v371_v56 = vadd.f32 1.0, %v992_v54 }
 0x101   :  { %1001 = vrcp.f32 %v372_v55  ;;  %v476_v49 = vpop.permute.xlu1 %475 }
 0x102   :  { %1003 = vrcp.f32 %v371_v56  ;;  %v994_v57 = vpop.eup %993 }
 0x103   :  { %v996_v58 = vpop.eup %995  ;;  %1005 = vtanh.f32 %v386_v51  ;;  %v374_v59 = vadd.f32 1.0, %v994_v57 }
 0x104   :  { %1007 = vtanh.f32 %v385_v52  ;;  %v373_v60 = vadd.f32 1.0, %v996_v58  ;;  %v998_v61 = vpop.eup %997  ;;  %v466_v52 = vpop.permute.xlu0 %465 }
 0x105   :  { %1009 = vrcp.f32 %v374_v59  ;;  %v1000_v62 = vpop.eup %999 }
 0x106   :  { %1011 = vrcp.f32 %v373_v60 }
 0x10b   :  { %v1002_v63 = vpop.eup %1001 }
 0x10c   :  { %v1004_v0 = vpop.eup %1003  ;;  %v392_v1 = vmul.f32 %v1002_v63, %v998_v61  ;;  %v481_v61 = vpop.permute.xlu1 %480 }
 0x10d   :  { %v391_v2 = vmul.f32 %v1004_v0, %v1000_v62  ;;  %v1006_v3 = vpop.eup %1005 }
 0x10e   :  { %v1008_v5 = vpop.eup %1007 }
 0x10f   :  { %v954_v4 = vpack.c.bf16 %v392_v1, %v391_v2  ;;  %v1010_v6 = vpop.eup %1009 }
 0x110   :  { %v1012_v7 = vpop.eup %1011  ;;  %v394_v8 = vmul.f32 %v1010_v6, %v1006_v3  ;;  %v496_v3 = vpop.permute.xlu0 %495 }
 0x111   :  { %955 = vmatprep.subr.bf16.mxu1 %v954_v4  ;;  %v393_v9 = vmul.f32 %v1012_v7, %v1008_v5 }
 0x112   :  { %957 = vmatpush3.bf16.msra.mxu1 %v954_v4 }
 0x113   :  { %v958_v10 = vpack.c.bf16 %v394_v8, %v393_v9 }
 0x115   :  { %959 = vmatprep.subr.bf16.mxu1 %v958_v10 }
 0x116   :  { %961 = vmatpush3.bf16.msra.mxu1 %v958_v10 }
 0x119   :  { %931 = vmatmul.mubr.msk.f32.vlgmr.msra.gmra.mrb[0].mxu1 %vm503_vm2, %v396_v11  ;;  %v501_v11 = vpop.permute.xlu0 %500 }
 0x11a   :  { %933 = vmatprep.mubr.msk.f32.mxu1 %vm503_vm2, %v397_v12 }
 0x11d   :  { %934 = vmatmul.mubr.msk.f32.gmra.mrb[2].mxu1 %vm503_vm2, %v398_v13 }
 0x11e   :  { %936 = vmatprep.mubr.msk.f32.mxu1 %vm503_vm2, %v399_v14 }
 0x121   :  { %937 = vmatmul.mubr.msk.f32.gmra.mrb[4].mxu1 %vm503_vm2, %v400_v15 }
 0x122   :  { %939 = vmatprep.mubr.msk.f32.mxu1 %vm503_vm2, %v401_v16 }
 0x125   :  { %940 = vmatmul.mubr.msk.f32.gmra.mrb[6].mxu1 %vm503_vm2, %v402_v17 }
 0x126   :  { %942 = vmatprep.mubr.msk.f32.mxu1 %vm503_vm2, %v403_v18 }
 0x129   :  { %943 = vmatmul.mubr.msk.f32.gmra.mrb[8].mxu1 %vm503_vm2, %v404_v19 }
 0x12a   :  { %945 = vmatprep.mubr.msk.f32.mxu1 %vm503_vm2, %v405_v20 }
 0x12d   :  { %946 = vmatmul.mubr.msk.f32.gmra.mrb[10].mxu1 %vm503_vm2, %v406_v21 }
 0x12e   :  { %948 = vmatprep.mubr.msk.f32.mxu1 %vm503_vm2, %v407_v22 }
 0x131   :  { %949 = vmatmul.mubr.msk.f32.gmra.mrb[12].mxu1 %vm503_vm2, %v408_v23 }
 0x132   :  { %951 = vmatprep.mubr.msk.f32.mxu1 %vm503_vm2, %v409_v24 }
 0x135   :  { %952 = vmatmul.mubr.msk.f32.gmra.mrb[14].mxu1 %vm503_vm2, %v410_v25 }
 0x1ec   :  { %v932_v29 = vpop.f32.mrb[0].mxu1 }
 0x1ed   :  { %v624_v30 = vadd.f32 %v932_v29, %v435_v26  ;;  %v618_v31 = vpop.f32.mrb[1].mxu1 }
 0x1ee   :  { %v619_v33 = vadd.f32 %v618_v31, %v430_v28 }
 0x1ef   :  { %v852_v34 = vmul.f32 -1.442695, %v624_v30 }
 0x1f0   :  { %v851_v36 = vmul.f32 -1.442695, %v619_v33  ;;  %v935_v37 = vpop.f32.mrb[2].mxu1 }
 0x1f1   :  { %1013 = vpow2.f32 %v852_v34  ;;  %v634_v38 = vadd.f32 %v935_v37, %v445_v27  ;;  %v628_v39 = vpop.f32.mrb[3].mxu1 }
 0x1f2   :  { %1015 = vpow2.f32 %v851_v36  ;;  %v629_v40 = vadd.f32 %v628_v39, %v440_v35 }
 0x1f3   :  { %v854_v41 = vmul.f32 -1.442695, %v634_v38 }
 0x1f4   :  { %v853_v43 = vmul.f32 -1.442695, %v629_v40  ;;  %v938_v44 = vpop.f32.mrb[4].mxu1 }
 0x1f5   :  { %1017 = vpow2.f32 %v854_v41  ;;  %v638_v45 = vpop.f32.mrb[5].mxu1 }
 0x1f6   :  { %1019 = vpow2.f32 %v853_v43  ;;  %v770_v43 = vpop.permute.xlu1 %769  ;;  %v765_v45 = vpop.permute.xlu0 %764 }
 0x1f8   :  { %v941_v47 = vpop.f32.mrb[6].mxu1 }
 0x1f9   :  { %v646_v48 = vpop.f32.mrb[7].mxu1 }
 0x1fb   :  { %v1014_v50 = vpop.eup %1013 }
 0x1fc   :  { %v1016_v51 = vpop.eup %1015  ;;  %v706_v53 = vadd.f32 1.0, %v1014_v50  ;;  %v944_v54 = vpop.f32.mrb[8].mxu1 }
 0x1fd   :  { %v705_v55 = vadd.f32 1.0, %v1016_v51  ;;  %v660_v56 = vadd.f32 %v944_v54, %v471_v42  ;;  %v654_v57 = vpop.f32.mrb[9].mxu1 }
 0x1fe   :  { %1021 = vrcp.f32 %v706_v53  ;;  %v655_v58 = vadd.f32 %v654_v57, %v466_v52  ;;  %v780_v57 = vpop.permute.xlu1 %779 }
 0x1ff   :  { %v1018_v59 = vpop.eup %1017  ;;  %1023 = vrcp.f32 %v705_v55  ;;  %v775_v55 = vpop.permute.xlu0 %774 }
 0x200   :  { %v1020_v60 = vpop.eup %1019  ;;  %v708_v62 = vadd.f32 1.0, %v1018_v59  ;;  %1025 = vtanh.f32 %v660_v56  ;;  %v947_v63 = vpop.f32.mrb[10].mxu1 }
 0x201   :  { %v707_v0 = vadd.f32 1.0, %v1020_v60  ;;  %1027 = vtanh.f32 %v655_v58  ;;  %v670_v1 = vadd.f32 %v947_v63, %v481_v61  ;;  %v664_v2 = vpop.f32.mrb[11].mxu1  ;;  %v800_v60 = vlaneseq }
 0x202   :  { %1029 = vrcp.f32 %v708_v62  ;;  %v665_v4 = vadd.f32 %v664_v2, %v476_v49 }
 0x203   :  { %1031 = vrcp.f32 %v707_v0  ;;  %v801_v63 = vshrl.u32 %v800_v60, 7 }
 0x204   :  { %1033 = vtanh.f32 %v670_v1  ;;  %v950_v5 = vpop.f32.mrb[12].mxu1 }
 0x205   :  { %1035 = vtanh.f32 %v665_v4  ;;  %v680_v6 = vadd.f32 %v950_v5, %v491_v32  ;;  %v674_v7 = vpop.f32.mrb[13].mxu1  ;;  %v802_v2 = vsub.s32 0, %v801_v63  ;;  %v798_v4 = vpop.permute.xlu0 %797 }
 0x206   :  { %v675_v8 = vadd.f32 %v674_v7, %v486_v46 }
 0x207   :  { %v856_v9 = vmul.f32 -1.442695, %v680_v6  ;;  %v803_v6 = vrot.slane %v798_v4, %v802_v2 }
 0x208   :  { %v1022_v10 = vpop.eup %1021  ;;  %v855_v12 = vmul.f32 -1.442695, %v675_v8  ;;  %v953_v13 = vpop.f32.mrb[14].mxu1 }
 0x209   :  { %v1024_v14 = vpop.eup %1023  ;;  %1037 = vpow2.f32 %v856_v9  ;;  %v690_v15 = vadd.f32 %v953_v13, %v501_v11  ;;  %v684_v16 = vpop.f32.mrb[15].mxu1 }
 0x20a   :  { %v1026_v17 = vpop.eup %1025  ;;  %1039 = vpow2.f32 %v855_v12  ;;  %v685_v18 = vadd.f32 %v684_v16, %v496_v3 }
 0x20b   :  { %v1028_v19 = vpop.eup %1027  ;;  %v746_v20 = vmul.f32 %v1026_v17, %v1022_v10  ;;  %v858_v21 = vmul.f32 -1.442695, %v690_v15 }
 0x20c   :  { %v1030_v22 = vpop.eup %1029  ;;  %v745_v23 = vmul.f32 %v1028_v19, %v1024_v14  ;;  %v857_v24 = vmul.f32 -1.442695, %v685_v18 }
 0x20d   :  { %v1032_v25 = vpop.eup %1031  ;;  %1041 = vpow2.f32 %v858_v21 }
 0x20e   :  { %v1034_v26 = vpop.eup %1033  ;;  %1043 = vpow2.f32 %v857_v24 }
 0x20f   :  { %v1036_v27 = vpop.eup %1035  ;;  %v748_v28 = vmul.f32 %v1034_v26, %v1030_v22  ;;  %1045 = vtanh.f32 %v746_v20 }
 0x210   :  { %v747_v29 = vmul.f32 %v1036_v27, %v1032_v25  ;;  %1047 = vtanh.f32 %v745_v23 }
 0x213   :  { %v1038_v30 = vpop.eup %1037 }
 0x214   :  { %v1040_v31 = vpop.eup %1039  ;;  %v734_v32 = vadd.f32 1.0, %v1038_v30 }
 0x215   :  { %v733_v33 = vadd.f32 1.0, %v1040_v31 }
 0x216   :  { %1049 = vrcp.f32 %v734_v32 }
 0x217   :  { %1051 = vrcp.f32 %v733_v33  ;;  %v1042_v34 = vpop.eup %1041 }
 0x218   :  { %v1044_v35 = vpop.eup %1043  ;;  %1053 = vtanh.f32 %v748_v28  ;;  %v736_v36 = vadd.f32 1.0, %v1042_v34 }
 0x219   :  { %1055 = vtanh.f32 %v747_v29  ;;  %v735_v37 = vadd.f32 1.0, %v1044_v35  ;;  %v1046_v38 = vpop.eup %1045 }
 0x21a   :  { %1057 = vrcp.f32 %v736_v36  ;;  %v1048_v39 = vpop.eup %1047 }
 0x21b   :  { %1059 = vrcp.f32 %v735_v37 }
 0x220   :  { %v1050_v40 = vpop.eup %1049 }
 0x221   :  { %v1052_v41 = vpop.eup %1051  ;;  %v754_v42 = vmul.f32 %v1050_v40, %v1046_v38 }
 0x222   :  { %v753_v44 = vmul.f32 %v1052_v41, %v1048_v39  ;;  %v1054_v47 = vpop.eup %1053 }
 0x223   :  { %v783_v46 = vmul.f32 %v770_v43, %v754_v42  ;;  %v1056_v49 = vpop.eup %1055 }
 0x224   :  { %v782_v48 = vmul.f32 %v765_v45, %v753_v44  ;;  %v1058_v50 = vpop.eup %1057 }
 0x225   :  { %v1060_v52 = vpop.eup %1059  ;;  %v756_v53 = vmul.f32 %v1058_v50, %v1054_v47 }
 0x226   :  { %v786_v51 = vadd.f32 %v783_v46, %v782_v48  ;;  %v755_v54 = vmul.f32 %v1060_v52, %v1056_v49 }
 0x227   :  { %v785_v58 = vmul.f32 %v780_v57, %v756_v53 }
 0x228   :  { %v784_v56 = vmul.f32 %v775_v55, %v755_v54 }
 0x22a   :  { %v787_v59 = vadd.f32 %v786_v51, %v784_v56 }
 0x22c   :  { %v788_v61 = vadd.f32 %v787_v59, %v785_v58 }
 0x22e   :  { %v789_v62 = vrot.slane %v788_v61, 4 }
 0x230   :  { %v790_v0 = vadd.f32 %v789_v62, %v788_v61 }
 0x232   :  { %v791_v1 = vrot.slane %v790_v0, 2 }
 0x234   :  { %v792_v3 = vadd.f32 %v791_v1, %v790_v0 }
 0x236   :  { %v793_v5 = vrot.slane %v792_v3, 1 }
 0x238   :  { %v794_v7 = vadd.f32 %v793_v5, %v792_v3 }
 0x23a   :  { %v804_v8 = vadd.f32 %v803_v6, %v794_v7 }
 0x23c   :  { %805 = vst [vmem:[%s1330_s7] sm:$0x1] %v804_v8 }

</bundles_post_ra>
